<compile_context>
chip_gen: v7x
topology: tpu7x:2x2x1
jax: 0.10.0
libtpu: 0.0.40
codegen_flags: <defaults>
</compile_context>

<pallas_src>
import numpy as np
import jax
import jax.numpy as jnp
from jax.experimental import pallas as pl
from jax.experimental.pallas import tpu as pltpu


def ffm_kernel(idx_ref, w2d_ref, out_ref):
    # idx_ref: (TB, F)   int32 -- offset-adjusted indices for this batch tile
    # w2d_ref: (V, F*D)  f32   -- stacked tables, column block j holds table j
    # out_ref: (TB, P*D) f32   -- lane-dense pairwise interactions
    idx = idx_ref[...]
    W2 = w2d_ref[...]
    TB, F = idx.shape
    V, FD = W2.shape
    D = FD // F

    # One-hot encode indices: (TB*F, V)  (V is tiny, so this stays cheap).
    iota_v = jax.lax.broadcasted_iota(jnp.int32, (TB, F, V), 2)
    onehot = (iota_v == idx[:, :, None]).astype(W2.dtype).reshape(TB * F, V)

    # Single fused MXU matmul: E[b*F + i, j*D:(j+1)*D] = emb_j(x[b, i]).
    E = jnp.dot(onehot, W2, preferred_element_type=jnp.float32)  # (TB*F, FD)
    E = E.reshape(TB, F, FD)

    # Pairwise field interactions from static lane slices, one dense store.
    parts = []
    for i in range(F - 1):
        for j in range(i + 1, F):
            a = E[:, i, j * D:(j + 1) * D]   # emb_j(x[:, i])  (TB, D)
            b = E[:, j, i * D:(i + 1) * D]   # emb_i(x[:, j])  (TB, D)
            parts.append(a * b)
    out_ref[...] = jnp.concatenate(parts, axis=-1)   # (TB, P*D), lane-dense


def ffm_forward(x, weights, offsets, *, tile_b=8):
    """x: (B, F) int32 raw per-field indices; weights: (F, V, D) f32."""
    B, F = x.shape
    _, V, D = weights.shape
    P = F * (F - 1) // 2
    assert B % tile_b == 0, "batch must be divisible by the batch tile"

    x_off = (x + offsets[None, :]).astype(jnp.int32)                # (B, F)
    # Host-side layout plumbing: (F, V, D) -> (V, F*D).
    w2d = jnp.transpose(weights, (1, 0, 2)).reshape(V, F * D)

    grid = (B // tile_b,)
    flops = 2 * B * F * V * F * D + B * P * D
    bytes_accessed = (x_off.size * 4 + w2d.size * 4 + B * P * D * 4)

    out2d = pl.pallas_call(
        ffm_kernel,
        out_shape=jax.ShapeDtypeStruct((B, P * D), jnp.float32),
        grid_spec=pltpu.PrefetchScalarGridSpec(
            num_scalar_prefetch=0,
            grid=grid,
            in_specs=[
                pl.BlockSpec((tile_b, F), lambda b: (b, 0)),
                pl.BlockSpec((V, F * D), lambda b: (0, 0)),
            ],
            out_specs=pl.BlockSpec((tile_b, P * D), lambda b: (b, 0)),
        ),
        compiler_params=pltpu.CompilerParams(
            dimension_semantics=("parallel",)),
        cost_estimate=pl.CostEstimate(
            flops=flops, transcendentals=0, bytes_accessed=bytes_accessed),
    )(x_off, w2d)

    return out2d.reshape(B, P, D)


def ffm_reference(x, weights, offsets):
    """Pure-JAX reference matching the PyTorch forward."""
    F = x.shape[1]
    xo = x + offsets[None, :]
    xs = [weights[i][xo] for i in range(F)]  # each (B, F, D)
    outs = []
    for i in range(F - 1):
        for j in range(i + 1, F):
            outs.append(xs[j][:, i] * xs[i][:, j])
    return jnp.stack(outs, axis=1)


if __name__ == "__main__":
    # Small, deterministic configuration.
    field_dims = (4, 6, 8, 10)           # F = 4 fields
    output_dim = 32                      # D
    batch = 16                           # B (two batch-grid steps of tile_b=8)
    F = len(field_dims)
    V = sum(field_dims)                  # 28
    D = output_dim

    offsets = jnp.asarray(
        np.array((0, *np.cumsum(field_dims)[:-1]), dtype=np.int32))

    key = jax.random.PRNGKey(0)
    k_w, k_x = jax.random.split(key)

    # Xavier-uniform init for each of the F embedding tables, shape (V, D).
    bound = float(np.sqrt(6.0 / (V + D)))
    weights = jax.random.uniform(
        k_w, (F, V, D), dtype=jnp.float32, minval=-bound, maxval=bound)

    # Per-field raw indices in [0, field_dims[f]).
    cols = []
    for f, fd in enumerate(field_dims):
        cols.append(jax.random.randint(
            jax.random.fold_in(k_x, f), (batch,), 0, fd, dtype=jnp.int32))
    x = jnp.stack(cols, axis=1)          # (B, F) int32

    out = ffm_forward(x, weights, offsets, tile_b=8)
    out = jax.block_until_ready(out)

    ref = ffm_reference(x, weights, offsets)
    np.testing.assert_allclose(np.asarray(out), np.asarray(ref),
                               rtol=1e-6, atol=1e-6)
    print("KERNEL_OK")
</pallas_src>

<mosaic_0001>
module attributes {stable_mosaic.version = 11 : i64} {
  func.func @ffm_kernel(%arg0: i32, %arg1: memref<8x4xi32, #tpu.memory_space<vmem>>, %arg2: memref<28x128xf32, #tpu.memory_space<vmem>>, %arg3: memref<8x192xf32, #tpu.memory_space<vmem>>) attributes {dimension_semantics = [#tpu.dimension_semantics<parallel>], iteration_bounds = array<i64: 2>, scalar_prefetch = 0 : i64, scratch_operands = 0 : i64, tpu.core_type = #tpu.core_type<tc>, window_params = [{transform_indices = @transform_0, window_bounds = array<i64: 8, 4>}, {pipeline_mode = #tpu.pipeline_mode<synchronous>, transform_indices = @transform_1, window_bounds = array<i64: 28, 128>}, {transform_indices = @transform_2, window_bounds = array<i64: 8, 192>}]} {
    %c0 = arith.constant 0 : index
    %c0_0 = arith.constant 0 : index
    %0 = vector.load %arg1[%c0, %c0_0] : memref<8x4xi32, #tpu.memory_space<vmem>>, vector<8x4xi32>
    %c0_1 = arith.constant 0 : index
    %c0_2 = arith.constant 0 : index
    %1 = vector.load %arg2[%c0_1, %c0_2] : memref<28x128xf32, #tpu.memory_space<vmem>>, vector<28x128xf32>
    %2 = tpu.iota {dimensions = array<i32: 2>} : vector<8x4x28xi32>
    %3 = vector.shape_cast %0 : vector<8x4xi32> to vector<8x4x1xi32>
    %4 = vector.broadcast %3 : vector<8x4x1xi32> to vector<8x4x28xi32>
    %5 = arith.cmpi eq, %2, %4 : vector<8x4x28xi32>
    %6 = arith.extui %5 : vector<8x4x28xi1> to vector<8x4x28xi32>
    %7 = arith.sitofp %6 : vector<8x4x28xi32> to vector<8x4x28xf32>
    %8 = vector.shape_cast %7 : vector<8x4x28xf32> to vector<32x28xf32>
    %cst = arith.constant dense<0.000000e+00> : vector<32x128xf32>
    %9 = tpu.matmul %8, %1, %cst {dimension_numbers = #tpu.dot_dimension_numbers<[1], [0], [0], [1], [0, 0, 1, 1], [], []>} : vector<32x28xf32>, vector<28x128xf32>, vector<32x128xf32> -> vector<32x128xf32>
    %10 = vector.shape_cast %9 : vector<32x128xf32> to vector<8x4x128xf32>
    %11 = vector.extract_strided_slice %10 {offsets = [0, 0, 32], sizes = [8, 1, 32], strides = [1, 1, 1]} : vector<8x4x128xf32> to vector<8x1x32xf32>
    %12 = vector.shape_cast %11 : vector<8x1x32xf32> to vector<8x32xf32>
    %13 = vector.extract_strided_slice %10 {offsets = [0, 1, 0], sizes = [8, 1, 32], strides = [1, 1, 1]} : vector<8x4x128xf32> to vector<8x1x32xf32>
    %14 = vector.shape_cast %13 : vector<8x1x32xf32> to vector<8x32xf32>
    %15 = arith.mulf %12, %14 : vector<8x32xf32>
    %16 = vector.extract_strided_slice %10 {offsets = [0, 0, 64], sizes = [8, 1, 32], strides = [1, 1, 1]} : vector<8x4x128xf32> to vector<8x1x32xf32>
    %17 = vector.shape_cast %16 : vector<8x1x32xf32> to vector<8x32xf32>
    %18 = vector.extract_strided_slice %10 {offsets = [0, 2, 0], sizes = [8, 1, 32], strides = [1, 1, 1]} : vector<8x4x128xf32> to vector<8x1x32xf32>
    %19 = vector.shape_cast %18 : vector<8x1x32xf32> to vector<8x32xf32>
    %20 = arith.mulf %17, %19 : vector<8x32xf32>
    %21 = vector.extract_strided_slice %10 {offsets = [0, 0, 96], sizes = [8, 1, 32], strides = [1, 1, 1]} : vector<8x4x128xf32> to vector<8x1x32xf32>
    %22 = vector.shape_cast %21 : vector<8x1x32xf32> to vector<8x32xf32>
    %23 = vector.extract_strided_slice %10 {offsets = [0, 3, 0], sizes = [8, 1, 32], strides = [1, 1, 1]} : vector<8x4x128xf32> to vector<8x1x32xf32>
    %24 = vector.shape_cast %23 : vector<8x1x32xf32> to vector<8x32xf32>
    %25 = arith.mulf %22, %24 : vector<8x32xf32>
    %26 = vector.extract_strided_slice %10 {offsets = [0, 1, 64], sizes = [8, 1, 32], strides = [1, 1, 1]} : vector<8x4x128xf32> to vector<8x1x32xf32>
    %27 = vector.shape_cast %26 : vector<8x1x32xf32> to vector<8x32xf32>
    %28 = vector.extract_strided_slice %10 {offsets = [0, 2, 32], sizes = [8, 1, 32], strides = [1, 1, 1]} : vector<8x4x128xf32> to vector<8x1x32xf32>
    %29 = vector.shape_cast %28 : vector<8x1x32xf32> to vector<8x32xf32>
    %30 = arith.mulf %27, %29 : vector<8x32xf32>
    %31 = vector.extract_strided_slice %10 {offsets = [0, 1, 96], sizes = [8, 1, 32], strides = [1, 1, 1]} : vector<8x4x128xf32> to vector<8x1x32xf32>
    %32 = vector.shape_cast %31 : vector<8x1x32xf32> to vector<8x32xf32>
    %33 = vector.extract_strided_slice %10 {offsets = [0, 3, 32], sizes = [8, 1, 32], strides = [1, 1, 1]} : vector<8x4x128xf32> to vector<8x1x32xf32>
    %34 = vector.shape_cast %33 : vector<8x1x32xf32> to vector<8x32xf32>
    %35 = arith.mulf %32, %34 : vector<8x32xf32>
    %36 = vector.extract_strided_slice %10 {offsets = [0, 2, 96], sizes = [8, 1, 32], strides = [1, 1, 1]} : vector<8x4x128xf32> to vector<8x1x32xf32>
    %37 = vector.shape_cast %36 : vector<8x1x32xf32> to vector<8x32xf32>
    %38 = vector.extract_strided_slice %10 {offsets = [0, 3, 64], sizes = [8, 1, 32], strides = [1, 1, 1]} : vector<8x4x128xf32> to vector<8x1x32xf32>
    %39 = vector.shape_cast %38 : vector<8x1x32xf32> to vector<8x32xf32>
    %40 = arith.mulf %37, %39 : vector<8x32xf32>
    %41 = tpu.concatenate %15, %20, %25, %30, %35, %40 in 1 : vector<8x32xf32>, vector<8x32xf32>, vector<8x32xf32>, vector<8x32xf32>, vector<8x32xf32>, vector<8x32xf32> -> vector<8x192xf32>
    %c0_3 = arith.constant 0 : index
    %c0_4 = arith.constant 0 : index
    %42 = vector.load %arg3[%c0_3, %c0_4] : memref<8x192xf32, #tpu.memory_space<vmem>>, vector<8x192xf32>
    tpu.vector_store %arg3[%c0_3, %c0_4], %41 {strides = array<i32>} : memref<8x192xf32, #tpu.memory_space<vmem>>, vector<8x192xf32>,
    return
  }
  func.func @transform_0(%arg0: i32) -> (i32, i32) {
    %c0_i32 = arith.constant 0 : i32
    %c0_i32_0 = arith.constant 0 : i32
    return %arg0, %c0_i32 : i32, i32
  }
  func.func @transform_1(%arg0: i32) -> (i32, i32) {
    %c0_i32 = arith.constant 0 : i32
    %c0_i32_0 = arith.constant 0 : i32
    %c0_i32_1 = arith.constant 0 : i32
    return %c0_i32, %c0_i32_0 : i32, i32
  }
  func.func @transform_2(%arg0: i32) -> (i32, i32) {
    %c0_i32 = arith.constant 0 : i32
    %c0_i32_0 = arith.constant 0 : i32
    return %arg0, %c0_i32 : i32, i32
  }
}

</mosaic_0001>

<bundles_post_ra>
// kernel: tpu_custom_call.1
= control target key start
LH: loop header
LB: loop body
LE: loop exit
PB: predicated region body
PF: predicated region fallthrough
CT: control target
= control target key end

     0   :  { %7 = vsyncpa [#allocation3], 0  ;;  %s1537_s0 = inlined_call_operand.vmem [shape: s32[16,4], index: 0, kind: input, shape index: {}]   ;;  %s1538_s1 = inlined_call_operand.hbm [shape: f32[28,128], index: 1, kind: input, shape index: {}]   ;;  %s1539_s2 = inlined_call_operand.hbm [shape: f32[16,192], index: 2, kind: output, shape index: {}]  }
   0x1   :  { %8 = vsyncpa [#allocation4], 0 }
   0x2   :  { %10 = vsyncpa [#allocation4 + $0x1], 0  ;;  %s1149_s9 = smov 0   ;;  %s1151_s10 = smov 0  }
   0x3   :  { %s1153_s11 = smov 0   ;;  %s1155_s12 = smov 0  }
   0x4 LB: > { %s1170_s13 = sadd.s32 4294967295, %s1123_s12   ;;  %s885_s14 = sadd.s32 4294967294, %s1123_s12   ;;  %s1123_s12 = sphi %s1155_s12, %s1555_s12   ;;  %s1119_s11 = sphi %s1153_s11, %s1554_s11   ;;  %s1115_s10 = sphi %s1151_s10, %s1553_s10   ;;  %s1111_s9 = sphi %s1149_s9, %s1552_s9  }
   0x5   : > { %s1174_s15 = sadd.s32 1, %s1123_s12   ;;  %s70_s16 = sadd.s32 1, %s1119_s11 }
   0x6   : > { %s67_s17 = ssub.s32 %s1123_s12, %s1174_s15  ;;  %p80_p0 = scmp.ne.s32.totalorder %s1119_s11, %s1115_s10 }
   0x7   : > { %p68_p1 = scmp.eq.s32.totalorder %s67_s17, 0  ;;  %p81_p2 = scmp.eq.s32.totalorder %s1170_s13, 1 }
   0x8   : > { %p86_p3 = scmp.ne.s32.totalorder %s1115_s10, %s1111_s9  ;;  %p87_p4 = scmp.eq.s32.totalorder %s885_s14, 1 }
   0x9   : > { %s1185_s18 = scalar_select %p68_p1, %s1119_s11, %s70_s16  }
   0xa   : > { %p1187_p5 = por %p81_p2, %p80_p0  ;;  %p1191_p6 = por %p87_p4, %p86_p3 }
   0xb   : > { %p886_p7 = scmp.ge.s32.totalorder %s1123_s12, 1  ;;  %p94_p8 = scmp.lt.s32.totalorder %s1123_s12, 3 }
   0xc   : > { %s1543_s19 = scalar_select %p1187_p5, 1, 0 }
   0xd   : > { %s1544_s20 = scalar_select %p1191_p6, 1, 0 }
   0xe   : > { %p1540_p9 = scmp.eq.s32.totalorder %s1170_s13, 0  ;;  %p1198_p10 = pnand %p886_p7, %p94_p8 }
   0xf   : > { %s1125_s22 = smov [#allocation2]   ;;  %s1029_s27 = scalar_lea.hbm %s1538_s1, 512 }
  0x10   : > { %s1545_s21 = scalar_select %p1198_p10, 1, 0 }
  0x11   : > { %s106_s23 = sshll.u32 %s1125_s22, 4  ;;  %p978_p11 = pneg %p1198_p10  ;;  %s107_s23 = int_to_ptr.vmem [resolvable:$true] %s106_s23 }
  0x12   : > { %p1030_p13 = scmp.ne.s32.totalorder %s1538_s1, %s1029_s27  ;;  %p1036_p3 = scmp.lt.u32.totalorder %s1029_s27, %s1538_s1 }
  0x13   : > { %p1206_p12 = pnand %p1540_p9, %p978_p11 }
  0x15   : > { %p1031_p0 = pneg %p1206_p12 }
  0x17   : > { %p1032_p1 = pnand %p1031_p0, %p1030_p13 }
  0x19   : > { %p1033_p2 = pneg %p1032_p1 }
  0x1b   : > { %p1038_p4 = pnand %p1036_p3, %p1033_p2 }
  0x1d   : > { %1041 = shalt.err (!%p1038_p4)
}
  0x1e   : > { %s1042_s4 = scalar_lea.vmem %s107_s23, 512  ;;  %p1050_p9 = scmp.lt.s32.totalorder %s107_s23, %s107_s23 }
  0x1f   : > { %p1043_p7 = scmp.ne.s32.totalorder %s107_s23, %s1042_s4  ;;  %p1051_p6 = scmp.lt.s32.totalorder %s1042_s4, %s1042_s4 }
  0x21   : > { %p1045_p8 = pnand %p1043_p7, %p1031_p0  ;;  %p1052_p5 = por %p1051_p6, %p1050_p9 }
  0x23   : > { %p1046_p11 = pneg %p1045_p8 }
  0x25   : > { %p1053_p10 = pnand %p1052_p5, %p1046_p11 }
  0x27   : > { %1056 = shalt.err (!%p1053_p10)
}
  0x28   : > { %s1126_s5 = smov 128   ;;  %s1127_s6 = smov 8  }
  0x29   : > { %981 = dma.hbm_to_vmem [thread:$0]  (!%p1206_p12), %s1538_s1, 512, %s107_s23, [#allocation3], %s1126_s5, %s1126_s5, %s1127_s6  }
  0x2a   : > { %p1547_p13 = scmp.ne.s32.totalorder %s1545_s21, 0 }
  0x2b   : > { %p1548_p1 = scmp.eq.s32.totalorder (!%p1547_p13), %s1170_s13, 0 }
  0x2c   : > { %129 = sbr.rel (%p1547_p13) target bundleno = 700 (0x2bc), region = 28 }
  0x33   : > { %1102 = dma.done.wait (%p1548_p1), [#allocation3], 512   ;;  %p1549_p0 = pmov %p1548_p1 }
  0x34   : > { %p150_p5 = scmp.lt.s32.totalorder %s1170_s13, 1  ;;  %v159_v0 = vlaneseq  ;;  %v155_v7 = vld [vmem:[#allocation2] sm:$0xff]  ;;  %v156_v8 = vld [vmem:[#allocation2 + $0x8] sm:$0xff]  ;;  %v157_v11 = vld [vmem:[#allocation2 + $0x10] sm:$0xff]  ;;  %vm262_vm0 = vcmask 1043456   ;;  %vm1128_vm1 = vmmov 1  }
  0x35   : > { %1104 = vsyncadd (%p1549_p0), [#allocation3], 4294966784  ;;  %v158_v12 = vld [vmem:[#allocation2 + $0x18] sm:$0xf]  ;;  %v958_v17 = vpack.c.bf16 %v156_v8, %v155_v7  ;;  %vm253_vm7 = vcmask 228352   ;;  %v1129_v30 = vmov 0.0  }
  0x36   : > { %s151_s14 = scalar_select %p150_p5, %s1170_s13, 1  ;;  %v162_v1 = vshrl.u32 %v159_v0, 7  ;;  %v962_v18 = vpack.c.bf16 %v158_v12, %v157_v11  ;;  %vm963_vm2 = vmpackc.low %vm262_vm0, %vm1128_vm1  ;;  %v160_v25 = vand.u32 127, %v159_v0  ;;  %vm547_vm12 = vcmask 1041409  }
  0x37   : > { %959 = vmatprep.subr.bf16.mxu0 %v958_v17  ;;  %968 = vmatprep.subr.bf16.mxu1 %v958_v17  ;;  %s1130_s23 = smov 64   ;;  %s1131_s24 = smov 32   ;;  %vm549_vm13 = vcmask 1042434   ;;  %vm551_vm14 = vcmask 1043459   ;;  %vm553_vm15 = vcmask 1044484   ;;  %vm555_vm0 = vcmask 1045509  }
  0x38   : > { %s892_s16 = sshll.u32 %s151_s14, 3  ;;  %v1234_v2 = vsub.s32 0, %v162_v1  ;;  %v1236_v3 = vsub.s32 2, %v162_v1  ;;  %v1241_v4 = vsub.s32 1, %v162_v1  ;;  %v184_v5 = vsub.s32 3, %v162_v1  ;;  %961 = vmatpush3.bf16.msra.mxu0 %v958_v17  ;;  %970 = vmatpush3.bf16.msra.mxu1 %v958_v17  ;;  %s1132_s25 = smov 96  }
  0x39   : > { %s153_s22 = scalar_lea.vmem %s1537_s0, %s892_s16  ;;  %v198_v13 = vsub.s32 5, %v162_v1  ;;  %v191_v16 = vsub.s32 4, %v162_v1  ;;  %v212_v21 = vsub.s32 7, %v162_v1  ;;  %v205_v22 = vsub.s32 6, %v162_v1  ;;  %964 = vmatprep.subr.msk.bf16.mxu0 %vm963_vm2, %v962_v18  ;;  %969 = vmatprep.subr.msk.bf16.mxu1 %vm963_vm2, %v962_v18  ;;  %s147_s26 = sand.u32 1, %s1115_s10  }
  0x3a   : > { %v154_v6 = vld [vmem:[%s153_s22] sm:$0xff]  ;;  %vm557_vm1 = vcmask 1046534   ;;  %s891_s27 = sshll.u32 %s147_s26, 4  ;;  %s935_s28 = sshll.u32 %s1170_s13, 8 }
  0x3b   : > { %v178_v9 = vrot.slane %v154_v6, %v1236_v3  ;;  %v164_v10 = vrot.slane %v154_v6, %v1234_v2  ;;  %v185_v14 = vrot.slane %v154_v6, %v184_v5  ;;  %v171_v15 = vrot.slane %v154_v6, %v1241_v4  ;;  %s149_s29 = scalar_lea.vmem [#allocation5], %s891_s27  ;;  %s1493_s5 = scalar_lea.hbm %s1539_s2, %s935_s28 }
  0x3c   : > { %v199_v19 = vrot.slane %v154_v6, %v198_v13  ;;  %v192_v20 = vrot.slane %v154_v6, %v191_v16  ;;  %967 = vmatpush3.bf16.msk.msra.mxu0 %vm963_vm2, %v962_v18  ;;  %971 = vmatpush3.bf16.msk.msra.mxu1 %vm963_vm2, %v962_v18  ;;  %v213_v23 = vrot.slane %v154_v6, %v212_v21  ;;  %vm559_vm2 = vcmask 1047559   ;;  %s814_s30 = sshll.u32 %s149_s29, 4  ;;  %s800_s13 = scalar_lea.sflag [#allocation4], %s147_s26  ;;  %s1495_s30 = int_to_ptr.vmem [resolvable:$true] %s814_s30 }
  0x3d   : > { %180 = vbcast.lane.b32.xlu1 %v178_v9, 256  ;;  %166 = vbcast.lane.b32.xlu0 %v164_v10, 256  ;;  %v206_v24 = vrot.slane %v154_v6, %v205_v22  ;;  %s1057_s6 = scalar_lea.vmem %s1495_s30, 256  ;;  %p1550_p9 = scmp.ne.s32.totalorder %s1543_s19, 0 }
  0x3e   : > { %p1058_p6 = scmp.ne.s32.totalorder %s1495_s30, %s1057_s6  ;;  %s1133_s7 = smov [#allocation5]  }
  0x3f   : > { %s1061_s8 = sshll.u32 %s1133_s7, 4  ;;  %s1062_s8 = int_to_ptr.vmem [resolvable:$false] %s1061_s8 }
  0x40   : > { %p1059_p10 = pnand %p1058_p6, %p1550_p9  ;;  %s1063_s14 = scalar_lea.vmem %s1062_s8, 512 }
  0x41   : > { %187 = vbcast.lane.b32.xlu1 %v185_v14, 256  ;;  %173 = vbcast.lane.b32.xlu0 %v171_v15, 256  ;;  %p1064_p2 = scmp.lt.s32.totalorder %s1495_s30, %s1062_s8  ;;  %p1065_p3 = scmp.lt.s32.totalorder %s1063_s14, %s1057_s6 }
  0x42   : > { %p1060_p12 = pneg %p1059_p10 }
  0x43   : > { %p1066_p4 = por %p1065_p3, %p1064_p2 }
  0x45   : > { %201 = vbcast.lane.b32.xlu1 %v199_v19, 256  ;;  %194 = vbcast.lane.b32.xlu0 %v192_v20, 256  ;;  %p1067_p7 = pnand %p1066_p4, %p1060_p12 }
  0x49   : > { %215 = vbcast.lane.b32.xlu1 %v213_v23, 256  ;;  %208 = vbcast.lane.b32.xlu0 %v206_v24, 256 }
  0xaf   : > { %v181_v26 = vpop.permute.xlu1 %180  ;;  %v167_v27 = vpop.permute.xlu0 %166 }
  0xb0   : > { %vm219_vm3 = vcmp.eq.s32.totalorder %v160_v25, %v181_v26  ;;  %vm217_vm4 = vcmp.eq.s32.totalorder %v160_v25, %v167_v27 }
  0xb1   : > { %v895_v31 = vsel %vm219_vm3, 1.0, %v1129_v30  ;;  %v893_v32 = vsel %vm217_vm4, 1.0, %v1129_v30  ;;  %vm790_vm3 = vcmask 261120   ;;  %vm792_vm4 = vcmask 523264  }
  0xb3   : > { %v188_v28 = vpop.permute.xlu1 %187  ;;  %v174_v29 = vpop.permute.xlu0 %173 }
  0xb4   : > { %vm220_vm5 = vcmp.eq.s32.totalorder %v160_v25, %v188_v28  ;;  %vm218_vm6 = vcmp.eq.s32.totalorder %v160_v25, %v174_v29 }
  0xb5   : > { %v896_v33 = vsel %vm220_vm5, 1.0, %v1129_v30  ;;  %v894_v34 = vsel %vm218_vm6, 1.0, %v1129_v30  ;;  %vm794_vm5 = vcmask 785408  }
  0xb6   : > { %v250_v35 = vcombine.low %v895_v31, %v896_v33  ;;  %v249_v36 = vcombine.low %v893_v32, %v894_v34 }
  0xb7   : > { %v202_v37 = vpop.permute.xlu1 %201  ;;  %v195_v38 = vpop.permute.xlu0 %194 }
  0xb8   : > { %vm222_vm8 = vcmp.eq.s32.totalorder %v160_v25, %v202_v37  ;;  %vm221_vm9 = vcmp.eq.s32.totalorder %v160_v25, %v195_v38  ;;  %952 = vmatprep.mubr.msk.f32.mxu0 %vm253_vm7, %v249_v36 }
  0xb9   : > { %v898_v39 = vsel %vm222_vm8, 1.0, %v1129_v30  ;;  %v897_v40 = vsel %vm221_vm9, 1.0, %v1129_v30  ;;  %953 = vmatmul.mubr.msk.f32.vlgmr.msra.gmra.mrb[0].mxu0 %vm253_vm7, %v250_v35 }
  0xba   : > { %v251_v41 = vcombine.low %v897_v40, %v898_v39 }
  0xbb   : > { %v216_v42 = vpop.permute.xlu1 %215  ;;  %v209_v43 = vpop.permute.xlu0 %208 }
  0xbc   : > { %vm224_vm10 = vcmp.eq.s32.totalorder %v160_v25, %v216_v42  ;;  %vm223_vm11 = vcmp.eq.s32.totalorder %v160_v25, %v209_v43  ;;  %955 = vmatprep.mubr.msk.f32.mxu1 %vm253_vm7, %v251_v41 }
  0xbd   : > { %v900_v44 = vsel %vm224_vm10, 1.0, %v1129_v30  ;;  %v899_v45 = vsel %vm223_vm11, 1.0, %v1129_v30 }
  0xbe   : > { %v252_v46 = vcombine.low %v899_v45, %v900_v44 }
  0xc0   : > { %956 = vmatmul.mubr.msk.f32.vlgmr.msra.gmra.mrb[0].mxu1 %vm253_vm7, %v252_v46 }
 0x18c   : > { %v1250_v47 = vpop.f32.mrb[0].mxu0 }
 0x18d   : > { %v1252_v48 = vpop.f32.mrb[1].mxu0  ;;  %v916_v49 = vrot.slane %v1250_v47, 10  ;;  %v908_v50 = vrot.slane %v1250_v47, 9  ;;  %v924_v51 = vrot.slane %v1250_v47, 11  ;;  %v1270_v56 = vcombine.high %v1250_v47, %v1250_v47 }
 0x18e   : > { %v906_v58 = vrot.slane %v1252_v48, 9  ;;  %v914_v60 = vrot.slane %v1252_v48, 10  ;;  %v922_v63 = vrot.slane %v1252_v48, 11  ;;  %v1290_v0 = vcombine.high %v1252_v48, %v1252_v48 }
 0x18f   : > { %431 = vrot.lane.b32.xlu1 %v916_v49, %s1130_s23  ;;  %383 = vrot.lane.b32.xlu0 %v908_v50, %s1131_s24  ;;  %v917_v59 = vrot.slane %v1270_v56, 10  ;;  %v925_v62 = vrot.slane %v1270_v56, 11  ;;  %v909_v9 = vrot.slane %v1270_v56, 9 }
 0x190   : > { %v907_v6 = vrot.slane %v1290_v0, 9  ;;  %v915_v8 = vrot.slane %v1290_v0, 10  ;;  %v923_v11 = vrot.slane %v1290_v0, 11 }
 0x193   : > { %479 = vrot.lane.b32.xlu0 %v924_v51, %s1132_s25  ;;  %v1260_v52 = vpop.f32.mrb[0].mxu1 }
 0x194   : > { %v1262_v53 = vpop.f32.mrb[1].mxu1  ;;  %v912_v54 = vrot.slane %v1260_v52, 9  ;;  %v920_v55 = vrot.slane %v1260_v52, 10  ;;  %v1282_v61 = vcombine.high %v1260_v52, %v1260_v52  ;;  %v928_v16 = vrot.slane %v1260_v52, 11 }
 0x195   : > { %v910_v57 = vrot.slane %v1262_v53, 9  ;;  %v918_v5 = vrot.slane %v1262_v53, 10  ;;  %v926_v7 = vrot.slane %v1262_v53, 11  ;;  %v1306_v10 = vcombine.high %v1262_v53, %v1262_v53 }
 0x196   : > { %391 = vrot.lane.b32.xlu1 %v912_v54, %s1131_s24  ;;  %v921_v1 = vrot.slane %v1282_v61, 10  ;;  %v913_v12 = vrot.slane %v1282_v61, 9  ;;  %v929_v17 = vrot.slane %v1282_v61, 11 }
 0x197   : > { %439 = vrot.lane.b32.xlu0 %v920_v55, %s1130_s23  ;;  %v919_v13 = vrot.slane %v1306_v10, 10  ;;  %v911_v14 = vrot.slane %v1306_v10, 9  ;;  %v927_v15 = vrot.slane %v1306_v10, 11 }
 0x19a   : > { %387 = vrot.lane.b32.xlu1 %v910_v57, %s1131_s24 }
 0x19b   : > { %379 = vrot.lane.b32.xlu0 %v906_v58, %s1131_s24 }
 0x19e   : > { %433 = vrot.lane.b32.xlu1 %v917_v59, %s1130_s23 }
 0x19f   : > { %427 = vrot.lane.b32.xlu0 %v914_v60, %s1130_s23 }
 0x1a2   : > { %481 = vrot.lane.b32.xlu1 %v925_v62, %s1132_s25 }
 0x1a3   : > { %475 = vrot.lane.b32.xlu0 %v922_v63, %s1132_s25 }
 0x1a6   : > { %441 = vrot.lane.b32.xlu1 %v921_v1, %s1130_s23 }
 0x1a7   : > { %435 = vrot.lane.b32.xlu0 %v918_v5, %s1130_s23 }
 0x1aa   : > { %381 = vrot.lane.b32.xlu1 %v907_v6, %s1131_s24 }
 0x1ab   : > { %483 = vrot.lane.b32.xlu0 %v926_v7, %s1132_s25 }
 0x1ae   : > { %429 = vrot.lane.b32.xlu1 %v915_v8, %s1130_s23 }
 0x1af   : > { %385 = vrot.lane.b32.xlu0 %v909_v9, %s1131_s24 }
 0x1b2   : > { %477 = vrot.lane.b32.xlu1 %v923_v11, %s1132_s25 }
 0x1b3   : > { %393 = vrot.lane.b32.xlu0 %v913_v12, %s1131_s24 }
 0x1b6   : > { %437 = vrot.lane.b32.xlu1 %v919_v13, %s1130_s23 }
 0x1b7   : > { %389 = vrot.lane.b32.xlu0 %v911_v14, %s1131_s24 }
 0x1ba   : > { %485 = vrot.lane.b32.xlu1 %v927_v15, %s1132_s25 }
 0x1bb   : > { %487 = vrot.lane.b32.xlu0 %v928_v16, %s1132_s25 }
 0x1be   : > { %489 = vrot.lane.b32.xlu1 %v929_v17, %s1132_s25 }
 0x201   : > { %v384_v18 = vpop.permute.xlu0 %383  ;;  %v432_v19 = vpop.permute.xlu1 %431 }
 0x202   : > { %v1323_v28 = vmul.f32 %v1250_v47, %v432_v19  ;;  %v405_v30 = vmul.f32 %v1250_v47, %v384_v18 }
 0x204   : > { %v583_v35 = vrot.slane %v1323_v28, %v1234_v2  ;;  %v717_v38 = vrot.slane %v1323_v28, %v1241_v4  ;;  %v526_v39 = vrot.slane %v405_v30, %v1234_v2  ;;  %v675_v40 = vrot.slane %v405_v30, %v1241_v4 }
 0x205   : > { %v480_v20 = vpop.permute.xlu0 %479  ;;  %v759_v42 = vrot.slane %v405_v30, %v1236_v3 }
 0x206   : > { %v1327_v31 = vmul.f32 %v1250_v47, %v480_v20 }
 0x208   : > { %v392_v21 = vpop.permute.xlu1 %391  ;;  %v633_v43 = vrot.slane %v1327_v31, %v1234_v2 }
 0x209   : > { %v440_v22 = vpop.permute.xlu0 %439  ;;  %v1330_v32 = vmul.f32 %v1260_v52, %v392_v21 }
 0x20a   : > { %v1351_v45 = vmul.f32 %v1260_v52, %v440_v22 }
 0x20b   : > { %v542_v44 = vrot.slane %v1330_v32, %v1234_v2  ;;  %v691_v46 = vrot.slane %v1330_v32, %v1241_v4  ;;  %v775_v47 = vrot.slane %v1330_v32, %v1236_v3 }
 0x20c   : > { %v388_v23 = vpop.permute.xlu1 %387 }
 0x20d   : > { %v380_v24 = vpop.permute.xlu0 %379  ;;  %v1333_v33 = vmul.f32 %v388_v23, %v1262_v53 }
 0x20e   : > { %v403_v36 = vmul.f32 %v380_v24, %v1252_v48 }
 0x20f   : > { %v534_v49 = vrot.slane %v1333_v33, %v1234_v2  ;;  %v683_v54 = vrot.slane %v1333_v33, %v1241_v4  ;;  %v767_v55 = vrot.slane %v1333_v33, %v1236_v3 }
 0x210   : > { %v434_v25 = vpop.permute.xlu1 %433  ;;  %v518_v57 = vrot.slane %v403_v36, %v1234_v2  ;;  %v667_v60 = vrot.slane %v403_v36, %v1241_v4  ;;  %v751_v62 = vrot.slane %v403_v36, %v1236_v3 }
 0x211   : > { %v428_v26 = vpop.permute.xlu0 %427  ;;  %v1343_v41 = vmul.f32 %v434_v25, %v1270_v56 }
 0x212   : > { %v451_v50 = vmul.f32 %v428_v26, %v1252_v48 }
 0x213   : > { %v587_v63 = vrot.slane %v1343_v41, %v1234_v2  ;;  %v721_v1 = vrot.slane %v1343_v41, %v1241_v4 }
 0x214   : > { %v482_v27 = vpop.permute.xlu1 %481  ;;  %v575_v9 = vrot.slane %v451_v50, %v1234_v2  ;;  %v709_v11 = vrot.slane %v451_v50, %v1241_v4 }
 0x215   : > { %v476_v29 = vpop.permute.xlu0 %475  ;;  %v502_v12 = vmul.f32 %v482_v27, %v1270_v56 }
 0x216   : > { %v499_v5 = vmul.f32 %v476_v29, %v1252_v48 }
 0x218   : > { %v442_v34 = vpop.permute.xlu1 %441  ;;  %v625_v23 = vrot.slane %v499_v5, %v1234_v2  ;;  %v637_v5 = vrot.slane %v502_v12, %v1234_v2 }
 0x219   : > { %v436_v37 = vpop.permute.xlu0 %435  ;;  %v1390_v24 = vmul.f32 %v442_v34, %v1282_v61 }
 0x21a   : > { %v455_v13 = vmul.f32 %v436_v37, %v1262_v53 }
 0x21b   : > { %v737_v32 = vrot.slane %v1390_v24, %v1241_v4 }
 0x21c   : > { %v382_v51 = vpop.permute.xlu1 %381  ;;  %v591_v27 = vrot.slane %v455_v13, %v1234_v2 }
 0x21d   : > { %v404_v58 = vmul.f32 %v382_v51, %v1290_v0  ;;  %v484_v59 = vpop.permute.xlu0 %483 }
 0x21f   : > { %v522_v6 = vrot.slane %v404_v58, %v1234_v2  ;;  %v671_v7 = vrot.slane %v404_v58, %v1241_v4  ;;  %v755_v8 = vrot.slane %v404_v58, %v1236_v3 }
 0x220   : > { %v430_v14 = vpop.permute.xlu1 %429 }
 0x221   : > { %v548_v15 = vsel %vm547_vm12, %v522_v6, %v518_v57  ;;  %v696_v16 = vsel %vm547_vm12, %v671_v7, %v667_v60  ;;  %v780_v48 = vsel %vm547_vm12, %v755_v8, %v751_v62  ;;  %v452_v17 = vmul.f32 %v430_v14, %v1290_v0  ;;  %v386_v18 = vpop.permute.xlu0 %385 }
 0x222   : > { %v550_v19 = vsel %vm549_vm13, %v526_v39, %v548_v15  ;;  %v697_v20 = vsel %vm549_vm13, %v675_v40, %v696_v16  ;;  %v781_v21 = vsel %vm549_vm13, %v759_v42, %v780_v48  ;;  %v406_v22 = vmul.f32 %v386_v18, %v1270_v56 }
 0x223   : > { %v579_v25 = vrot.slane %v452_v17, %v1234_v2  ;;  %v713_v26 = vrot.slane %v452_v17, %v1241_v4  ;;  %v503_v56 = vmul.f32 %v484_v59, %v1262_v53  ;;  %v599_v62 = vrot.slane %v1351_v45, %v1234_v2 }
 0x224   : > { %v530_v29 = vrot.slane %v406_v22, %v1234_v2  ;;  %v679_v30 = vrot.slane %v406_v22, %v1241_v4  ;;  %v763_v33 = vrot.slane %v406_v22, %v1236_v3  ;;  %v478_v36 = vpop.permute.xlu1 %477  ;;  %v725_v6 = vrot.slane %v455_v13, %v1241_v4 }
 0x225   : > { %v604_v34 = vsel %vm547_vm12, %v579_v25, %v575_v9  ;;  %v738_v37 = vsel %vm547_vm12, %v713_v26, %v709_v11  ;;  %v500_v39 = vmul.f32 %v478_v36, %v1290_v0  ;;  %v394_v40 = vpop.permute.xlu0 %393  ;;  %v603_v9 = vrot.slane %v1390_v24, %v1234_v2 }
 0x226   : > { %v605_v41 = vsel %vm549_vm13, %v583_v35, %v604_v34  ;;  %v739_v42 = vsel %vm549_vm13, %v717_v38, %v738_v37  ;;  %v552_v50 = vsel %vm551_vm14, %v530_v29, %v550_v19  ;;  %v698_v51 = vsel %vm551_vm14, %v679_v30, %v697_v20 }
 0x227   : > { %v782_v53 = vsel %vm551_vm14, %v763_v33, %v781_v21  ;;  %v629_v57 = vrot.slane %v500_v39, %v1234_v2  ;;  %v410_v58 = vmul.f32 %v394_v40, %v1282_v61  ;;  %v606_v0 = vsel %vm551_vm14, %v587_v63, %v605_v41 }
 0x228   : > { %v438_v59 = vpop.permute.xlu1 %437  ;;  %v607_v60 = vsel %vm553_vm15, %v591_v27, %v606_v0  ;;  %v554_v28 = vsel %vm553_vm15, %v534_v49, %v552_v50  ;;  %v699_v35 = vsel %vm553_vm15, %v683_v54, %v698_v51  ;;  %v783_v38 = vsel %vm553_vm15, %v767_v55, %v782_v53 }
 0x229   : > { %v654_v7 = vsel %vm547_vm12, %v629_v57, %v625_v23  ;;  %v390_v8 = vpop.permute.xlu0 %389  ;;  %v456_v49 = vmul.f32 %v438_v59, %v1306_v10  ;;  %v740_v55 = vsel %vm551_vm14, %v721_v1, %v739_v42  ;;  %v641_v11 = vrot.slane %v503_v56, %v1234_v2 }
 0x22a   : > { %v655_v63 = vsel %vm549_vm13, %v633_v43, %v654_v7  ;;  %v408_v54 = vmul.f32 %v390_v8, %v1306_v10  ;;  %v741_v13 = vsel %vm553_vm15, %v725_v6, %v740_v55  ;;  %v546_v14 = vrot.slane %v410_v58, %v1234_v2 }
 0x22b   : > { %v656_v12 = vsel %vm551_vm14, %v637_v5, %v655_v63  ;;  %v595_v31 = vrot.slane %v456_v49, %v1234_v2  ;;  %v729_v1 = vrot.slane %v456_v49, %v1241_v4  ;;  %v733_v27 = vrot.slane %v1351_v45, %v1241_v4 }
 0x22c   : > { %v538_v43 = vrot.slane %v408_v54, %v1234_v2  ;;  %v687_v15 = vrot.slane %v408_v54, %v1241_v4  ;;  %v486_v16 = vpop.permute.xlu1 %485  ;;  %v771_v48 = vrot.slane %v408_v54, %v1236_v3  ;;  %v657_v19 = vsel %vm553_vm15, %v641_v11, %v656_v12 }
 0x22d   : > { %v504_v17 = vmul.f32 %v486_v16, %v1306_v10  ;;  %v488_v18 = vpop.permute.xlu0 %487  ;;  %v608_v21 = vsel %vm555_vm0, %v595_v31, %v607_v60  ;;  %v695_v34 = vrot.slane %v410_v58, %v1241_v4  ;;  %v779_v50 = vrot.slane %v410_v58, %v1236_v3 }
 0x22e   : > { %v505_v20 = vmul.f32 %v1260_v52, %v488_v18  ;;  %v556_v22 = vsel %vm555_vm0, %v538_v43, %v554_v28  ;;  %v700_v23 = vsel %vm555_vm0, %v687_v15, %v699_v35  ;;  %v609_v26 = vsel %vm557_vm1, %v599_v62, %v608_v21 }
 0x22f   : > { %v645_v25 = vrot.slane %v504_v17, %v1234_v2  ;;  %v558_v10 = vsel %vm557_vm1, %v542_v44, %v556_v22  ;;  %v701_v52 = vsel %vm557_vm1, %v691_v46, %v700_v23  ;;  %v610_v33 = vsel %vm559_vm2, %v603_v9, %v609_v26 }
 0x230   : > { %v649_v29 = vrot.slane %v505_v20, %v1234_v2  ;;  %v490_v30 = vpop.permute.xlu1 %489  ;;  %v560_v36 = vsel %vm559_vm2, %v546_v14, %v558_v10  ;;  %611 = vrot.lane.b32.xlu1 %v610_v33, %s1132_s25  ;;  %v784_v46 = vsel %vm555_vm0, %v771_v48, %v783_v38  ;;  %v702_v41 = vsel %vm559_vm2, %v695_v34, %v701_v52 }
 0x231   : > { %v506_v56 = vmul.f32 %v490_v30, %v1282_v61  ;;  %561 = vrot.lane.b32.xlu0 %v560_v36, %s1132_s25  ;;  %v658_v44 = vsel %vm555_vm0, %v645_v25, %v657_v19  ;;  %v785_v37 = vsel %vm557_vm1, %v775_v47, %v784_v46  ;;  %v742_v61 = vsel %vm555_vm0, %v729_v1, %v741_v13 }
 0x232   : > { %v659_v45 = vsel %vm557_vm1, %v649_v29, %v658_v44  ;;  %v743_v40 = vsel %vm557_vm1, %v733_v27, %v742_v61  ;;  %v786_v47 = vsel %vm559_vm2, %v779_v50, %v785_v37 }
 0x233   : > { %v653_v39 = vrot.slane %v506_v56, %v1234_v2  ;;  %v744_v2 = vsel %vm559_vm2, %v737_v32, %v743_v40 }
 0x234   : > { %703 = vrot.lane.b32.xlu1 %v702_v41, %s1131_s24 }
 0x235   : > { %v660_v42 = vsel %vm559_vm2, %v653_v39, %v659_v45 }
 0x236   : > { %661 = vrot.lane.b32.xlu0 %v660_v42, %s1132_s25 }
 0x238   : > { %787 = vrot.lane.b32.xlu1 %v786_v47, %s1130_s23 }
 0x23a   : > { %745 = vrot.lane.b32.xlu0 %v744_v2, %s1131_s24 }
 0x2a2   : > { %v612_v51 = vpop.permute.xlu1 %611 }
 0x2a3   : > { %v562_v53 = vpop.permute.xlu0 %561 }
 0x2a4   : > { %v791_v57 = vsel %vm790_vm3, %v562_v53, %v612_v51 }
 0x2a6   : > { %v704_v3 = vpop.permute.xlu1 %703 }
 0x2a8   : > { %v662_v4 = vpop.permute.xlu0 %661 }
 0x2a9   : > { %v793_v24 = vsel %vm792_vm4, %v791_v57, %v662_v4 }
 0x2aa   : > { %v795_v58 = vsel %vm794_vm5, %v793_v24, %v704_v3  ;;  %v788_v0 = vpop.permute.xlu1 %787 }
 0x2ab   : > { %797 = vst [vmem:[%s149_s29] sm:$0xff] %v795_v58 }
 0x2ac   : > { %v746_v59 = vpop.permute.xlu0 %745 }
 0x2ad   : > { %v796_v60 = vsel %vm790_vm3, %v746_v59, %v788_v0 }
 0x2ae   : > { %798 = vst.msk [vmem:[%s149_s29 + $0x8] sm:$0xff] %vm792_vm4, %v796_v60 }
 0x2af   : > { %1070 = shalt.err (!%p1067_p7)
}
 0x2b0   : > { %s1071_s16 = scalar_lea.hbm %s1493_s5, 256  ;;  %s1075_s22 = scalar_lea.hbm %s1539_s2, 512 }
 0x2b1   : > { %p1072_p8 = scmp.ne.s32.totalorder %s1493_s5, %s1071_s16  ;;  %p1076_p1 = scmp.lt.u32.totalorder %s1493_s5, %s1539_s2 }
 0x2b2   : > { %p1077_p0 = scmp.lt.u32.totalorder %s1075_s22, %s1071_s16  ;;  %p1079_p6 = scmp.lt.u32.totalorder %s1071_s16, %s1493_s5 }
 0x2b3   : > { %p1073_p11 = pnand %p1072_p8, %p1550_p9 }
 0x2b4   : > { %p1078_p5 = por %p1077_p0, %p1076_p1 }
 0x2b5   : > { %p1074_p13 = pneg %p1073_p11 }
 0x2b6   : > { %p1080_p10 = por %p1079_p6, %p1078_p5 }
 0x2b8   : > { %p1081_p12 = pnand %p1080_p10, %p1074_p13 }
 0x2ba   : > { %1084 = shalt.err (!%p1081_p12)
}
 0x2bb   : > { %976 = dma.vmem_to_hbm [thread:$0]  (%p1550_p9), %s1495_s30, 256, %s1493_s5, %s800_s13  }
 0x2bc PF: > { %p988_p2 = scmp.ge.s32.totalorder %s1123_s12, 2  ;;  %s826_s25 = sand.u32 1, %s1111_s9  }
 0x2bd   : > { %p1551_p3 = scmp.ne.s32.totalorder %s1544_s20, 0  ;;  %s827_s26 = scalar_lea.sflag [#allocation4], %s826_s25 }
 0x2bf   : > { %p983_p4 = pnand %p988_p2, %p1551_p3 }
 0x2c1   : > { %1106 = dma.done.wait (!%p983_p4), %s827_s26, 256  }
 0x2c2   : > { %1108 = vsyncadd (!%p983_p4), %s827_s26, 4294967040  ;;  %p13_p7 = scmp.ge.s32.totalorder %s1174_s15, 4   ;;  %s1552_s9 = smov %s1115_s10 }
 0x2c3   : > { %s1553_s10 = smov %s1119_s11  ;;  %s1554_s11 = smov %s1185_s18 }
 0x2c4   : > { %s1555_s12 = smov %s1174_s15  ;;  %15 = sbr.rel (!%p13_p7) target bundleno = 4 (0x4), region = 68 }
 0x2cb   :  { %832 = vsyncpa [#allocation3], 1 }
 0x2cc   :  { %834 = vsyncpa [#allocation3 + $0x1], 1 }
 0x2cd   :  { %835 = vsyncpa [#allocation4], 1 }
 0x2ce   :  { %837 = vsyncpa [#allocation4 + $0x1], 1 }

</bundles_post_ra>
